<compile_context>
chip_gen: v6e
topology: v6e:2x2x1
jax: 0.10.0
libtpu: 0.0.40
codegen_flags: <defaults>
</compile_context>

<pallas_src>
import functools

import numpy as np
import jax
import jax.numpy as jnp
from jax.experimental import pallas as pl
from jax.experimental.pallas import tpu as pltpu


def _round_up(x, m):
    return ((x + m - 1) // m) * m


def _cpc_tile_kernel(hist_x_ref, w_ref, b_ref, emb_t_ref, emb_pos_ref,
                     bias_ref, out_ref, *, n_rows, tile_n):
    i = pl.program_id(0)

    # linear predictor on the MXU: (TN, Kp)bf16 @ (Kp, Hp)bf16 -> (TN, Hp)f32
    predicts = jnp.dot(hist_x_ref[...], w_ref[...],
                       preferred_element_type=jnp.float32) + b_ref[...]

    # positive logit: per-row dot with the streamed positive-embedding tile
    # (replaces the old (TN, Np) one-hot column select; Hp-wide work only)
    pos_logit = jnp.sum(predicts * emb_pos_ref[...].astype(jnp.float32),
                        axis=-1, keepdims=True)                          # (TN, 1)

    # all-pairs logits against the embedding table: (TN, Hp) @ (Hp, Np) -> (TN, Np)
    all_logits = jnp.dot(predicts.astype(emb_t_ref.dtype), emb_t_ref[...],
                         preferred_element_type=jnp.float32)

    # additive softmax bias: 0 on the m sampled negative columns, -1e30 elsewhere
    # (upcast bf16 -> f32 on load; no compare/select, no extra mask multiply)
    neg_logits = all_logits + bias_ref[...].astype(jnp.float32)          # (TN, Np)

    row_max = jnp.maximum(jnp.max(neg_logits, axis=-1, keepdims=True), pos_logit)
    # exp(-1e30 - row_max) underflows to exactly 0.0 -> unselected columns vanish
    denom = (jnp.sum(jnp.exp(neg_logits - row_max), axis=-1, keepdims=True)
             + jnp.exp(pos_logit - row_max))
    log_sm0 = (pos_logit - row_max) - jnp.log(denom)                     # (TN, 1)

    # drop padded rows (cheap (TN, 1) iota; padded rows already evaluate to 0)
    row_ids = i * tile_n + jax.lax.broadcasted_iota(jnp.int32, (tile_n, 1), 0)
    log_sm0 = jnp.where(row_ids < n_rows, log_sm0, 0.0)

    # lane-dense per-tile partial sum
    out_ref[...] = jnp.broadcast_to(jnp.sum(log_sm0),
                                    out_ref.shape).astype(jnp.float32)


def _vmem_budget_bytes(tn, kp, hp, np_cols):
    """Compute a vmem_limit from the actual footprint, capped by physical VMEM."""
    bf, f32 = 2, 4
    resident = kp * hp * bf + hp * np_cols * bf + hp * f32       # W, emb^T, bias row
    streamed = 2 * (tn * kp * bf + tn * np_cols * bf             # double-buffered
                    + tn * hp * bf + 8 * 128 * f32)              # hist_x, bias, emb_pos, out
    interm = 4 * tn * np_cols * f32                              # live f32 (TN, Np) temps
    need = resident + streamed + interm
    try:
        cap = int(pltpu.get_tpu_info().vmem_capacity_bytes)      # 64 MiB v7x, 128 MiB v5e/v6e
    except Exception:
        cap = 64 * 1024 * 1024                                   # conservative fallback
    limit = min(int(need * 1.5) + (8 << 20), int(cap * 0.85))
    return max(limit, 32 * 1024 * 1024)


def cpc_loss_v2(embeddings, target, w, b, k_pos_samples, m_neg_samples, perm_key):
    """Mirrors CPCLossV2.forward. Returns (loss_scalar, None)."""
    N, h = embeddings.shape
    k = k_pos_samples
    n = N // k
    m = min(m_neg_samples, k * (n - 1))
    if m <= 0:
        # n == 1: softmax over the single positive logit is identically 0
        return jnp.float32(0.0), None

    # ---------------- host-side index bookkeeping (glue) ----------------
    idx = np.arange(N)
    hist_x_idx = idx[(idx + 1) % k != 0]
    hist_y_idx = idx[(idx + 1) % k == 0]                          # rows i*k + (k-1)

    # negative candidate columns per sequence (torch nonzero(...)[:, 1] analogue)
    t = np.asarray(target)
    cand_mask = t[None, :] != t[::k][:, None]                     # (n, N)
    # TODO(synk): assumes every sequence has exactly k*(n-1) negative candidates
    cand_cols = np.nonzero(cand_mask)[1].reshape(n, -1).astype(np.int32)

    # vectorized torch.randperm analogue: one permutation per row via vmap
    keys = jax.random.split(perm_key, n)
    perms = jax.vmap(
        lambda kk: jax.random.permutation(kk, cand_cols.shape[1]))(keys)[:, :m]
    sel = jnp.take_along_axis(jnp.asarray(cand_cols), perms, axis=1)   # (n, m)

    # ---------------- padded, lane-dense layouts (built directly in bf16) ----
    Hp = _round_up(h, 128)
    Np = _round_up(N, 128)
    kh = (k - 1) * h
    Kp = _round_up(kh, 128)

    TN = min(256, _round_up(n, 16))          # rows/tile; multiple of 16 for bf16
    n_pad = _round_up(n, TN)
    if n > 16 and n_pad // TN < 2:
        # give the second v7x TensorCore a tile when the row count allows it
        TN = _round_up((n + 1) // 2, 16)
        n_pad = _round_up(n, TN)
    num_tiles = n_pad // TN

    bf16 = jnp.bfloat16
    hist_x = embeddings[hist_x_idx].reshape(n, kh).astype(bf16)
    hx_p = jnp.zeros((n_pad, Kp), bf16).at[:n, :kh].set(hist_x)

    w_p = jnp.zeros((Kp, Hp), bf16).at[:kh, :h].set(w.astype(bf16))
    b_p = jnp.zeros((1, Hp), jnp.float32).at[0, :h].set(b)

    emb_bf = embeddings.astype(bf16)
    emb_t = jnp.zeros((Hp, Np), bf16).at[:h, :N].set(emb_bf.T)        # resident
    emb_pos = jnp.zeros((n_pad, Hp), bf16).at[:n, :h].set(emb_bf[hist_y_idx])
    # TODO(synk): for very large N, tile Np with an inner grid axis + online
    # softmax instead of keeping (Hp, Np) emb^T resident (matters on v7x's 64 MiB).

    # additive softmax bias (bf16): 0 on sampled negative columns, -1e30 elsewhere;
    # built with a vectorized compare (no serialized scatter, no f32 intermediate)
    col = jnp.arange(Np, dtype=jnp.int32)
    neg_mask = jnp.any(sel[:, :, None] == col[None, None, :], axis=1)  # (n, Np)
    neg_mask = jnp.zeros((n_pad, Np), jnp.bool_).at[:n].set(neg_mask)
    bias = jnp.where(neg_mask, jnp.zeros((), bf16), jnp.full((), -1e30, bf16))

    # ---------------- Pallas call ----------------
    kernel = functools.partial(_cpc_tile_kernel, n_rows=n, tile_n=TN)

    cost = pl.CostEstimate(
        flops=int(num_tiles * (2 * TN * Kp * Hp + 2 * TN * Hp * Np) + 2 * n_pad * Hp),
        transcendentals=int(n_pad * (Np + 1)),
        bytes_accessed=int(hx_p.size * 2 + bias.size * 2 + emb_pos.size * 2
                           + w_p.size * 2 + emb_t.size * 2 + b_p.size * 4
                           + num_tiles * 8 * 128 * 4),
    )

    partials = pl.pallas_call(
        kernel,
        out_shape=jax.ShapeDtypeStruct((num_tiles, 8, 128), jnp.float32),
        grid=(num_tiles,),
        in_specs=[
            pl.BlockSpec((TN, Kp), lambda i: (i, 0)),     # hist_x tile      (bf16)
            pl.BlockSpec((Kp, Hp), lambda i: (0, 0)),     # W, resident      (bf16)
            pl.BlockSpec((1, Hp), lambda i: (0, 0)),      # bias row         (f32)
            pl.BlockSpec((Hp, Np), lambda i: (0, 0)),     # emb^T, resident  (bf16)
            pl.BlockSpec((TN, Hp), lambda i: (i, 0)),     # positive emb tile (bf16)
            pl.BlockSpec((TN, Np), lambda i: (i, 0)),     # additive bias     (bf16)
        ],
        out_specs=pl.BlockSpec((1, 8, 128), lambda i: (i, 0, 0)),
        compiler_params=pltpu.CompilerParams(
            dimension_semantics=("parallel",),
            vmem_limit_bytes=_vmem_budget_bytes(TN, Kp, Hp, Np)),
        cost_estimate=cost,
    )(hx_p, w_p, b_p, emb_t, emb_pos, bias)

    loss = -(jnp.sum(partials[:, 0, 0]) / n)
    return loss, None


def _cpc_loss_reference(embeddings, target, w, b, k, m_neg, perm_key):
    """Pure-JAX mirror of CPCLossV2.forward (same negative sampling as above)."""
    N, h = embeddings.shape
    n = N // k
    m = min(m_neg, k * (n - 1))
    idx = np.arange(N)
    hist_x = embeddings[idx[(idx + 1) % k != 0]].reshape(n, -1)
    hist_y = embeddings[idx[(idx + 1) % k == 0]]
    predicts = hist_x @ w + b
    pos = jnp.sum(predicts * hist_y, axis=-1)
    t = np.asarray(target)
    cand_cols = np.nonzero(t[None, :] != t[::k][:, None])[1].reshape(n, -1).astype(np.int32)
    keys = jax.random.split(perm_key, n)
    perms = jax.vmap(
        lambda kk: jax.random.permutation(kk, cand_cols.shape[1]))(keys)[:, :m]
    sel = jnp.take_along_axis(jnp.asarray(cand_cols), perms, axis=1)
    neg_embed = embeddings[sel]                                   # (n, m, h)
    neg = jnp.einsum("nh,nmh->nm", predicts, neg_embed)
    logits = jnp.concatenate([pos[:, None], neg], axis=-1)
    return -jnp.mean(jax.nn.log_softmax(logits, axis=-1)[:, 0])


if __name__ == "__main__":
    # small shapes consistent with the module
    k_pos_samples = 4
    m_neg_samples = 8
    n = 4
    h = 32
    N = n * k_pos_samples

    key = jax.random.PRNGKey(0)
    k_emb, k_w, k_b, k_perm = jax.random.split(key, 4)

    embeddings = jax.random.normal(k_emb, (N, h), dtype=jnp.float32)
    # one class label per block of k_pos_samples rows (CPC convention)
    target = jnp.repeat(jnp.arange(n, dtype=jnp.int32), k_pos_samples)

    # linear_predictor = nn.Linear((k-1)*h, h); weight stored transposed
    fan_in = (k_pos_samples - 1) * h
    bound = 1.0 / float(np.sqrt(fan_in))
    w = jax.random.uniform(k_w, (fan_in, h), minval=-bound, maxval=bound,
                           dtype=jnp.float32)
    b = jax.random.uniform(k_b, (h,), minval=-bound, maxval=bound,
                           dtype=jnp.float32)

    loss, aux = cpc_loss_v2(embeddings, target, w, b,
                            k_pos_samples, m_neg_samples, k_perm)
    loss = jax.block_until_ready(loss)
    assert np.isfinite(np.asarray(loss)), "loss is not finite"

    ref = jax.block_until_ready(_cpc_loss_reference(
        embeddings, target, w, b, k_pos_samples, m_neg_samples, k_perm))
    np.testing.assert_allclose(np.asarray(loss), np.asarray(ref),
                               rtol=5e-2, atol=5e-2)
    print("KERNEL_OK")
</pallas_src>

<mosaic_0001>
module attributes {stable_mosaic.version = 11 : i64} {
  func.func @_cpc_tile_kernel(%arg0: i32, %arg1: memref<16x128xbf16, #tpu.memory_space<vmem>>, %arg2: memref<128x128xbf16, #tpu.memory_space<vmem>>, %arg3: memref<1x128xf32, #tpu.memory_space<vmem>>, %arg4: memref<128x128xbf16, #tpu.memory_space<vmem>>, %arg5: memref<16x128xbf16, #tpu.memory_space<vmem>>, %arg6: memref<16x128xbf16, #tpu.memory_space<vmem>>, %arg7: memref<1x8x128xf32, #tpu.memory_space<vmem>>) attributes {dimension_semantics = [#tpu.dimension_semantics<parallel>], iteration_bounds = array<i64: 1>, scalar_prefetch = 0 : i64, scratch_operands = 0 : i64, tpu.core_type = #tpu.core_type<tc>, window_params = [{transform_indices = @transform_0, window_bounds = array<i64: 16, 128>}, {pipeline_mode = #tpu.pipeline_mode<synchronous>, transform_indices = @transform_1, window_bounds = array<i64: 128, 128>}, {pipeline_mode = #tpu.pipeline_mode<synchronous>, transform_indices = @transform_2, window_bounds = array<i64: 1, 128>}, {pipeline_mode = #tpu.pipeline_mode<synchronous>, transform_indices = @transform_3, window_bounds = array<i64: 128, 128>}, {transform_indices = @transform_4, window_bounds = array<i64: 16, 128>}, {transform_indices = @transform_5, window_bounds = array<i64: 16, 128>}, {transform_indices = @transform_6, window_bounds = array<i64: 1, 8, 128>}]} {
    %c0 = arith.constant 0 : index
    %c0_0 = arith.constant 0 : index
    %0 = vector.load %arg1[%c0, %c0_0] : memref<16x128xbf16, #tpu.memory_space<vmem>>, vector<16x128xbf16>
    %c0_1 = arith.constant 0 : index
    %c0_2 = arith.constant 0 : index
    %1 = vector.load %arg2[%c0_1, %c0_2] : memref<128x128xbf16, #tpu.memory_space<vmem>>, vector<128x128xbf16>
    %cst = arith.constant dense<0.000000e+00> : vector<16x128xf32>
    %2 = tpu.matmul %0, %1, %cst {dimension_numbers = #tpu.dot_dimension_numbers<[1], [0], [0], [1], [0, 0, 1, 1], [], []>} : vector<16x128xbf16>, vector<128x128xbf16>, vector<16x128xf32> -> vector<16x128xf32>
    %c0_3 = arith.constant 0 : index
    %c0_4 = arith.constant 0 : index
    %3 = vector.load %arg3[%c0_3, %c0_4] : memref<1x128xf32, #tpu.memory_space<vmem>>, vector<1x128xf32>
    %4 = vector.broadcast %3 : vector<1x128xf32> to vector<16x128xf32>
    %5 = arith.addf %2, %4 : vector<16x128xf32>
    %c0_5 = arith.constant 0 : index
    %c0_6 = arith.constant 0 : index
    %6 = vector.load %arg5[%c0_5, %c0_6] : memref<16x128xbf16, #tpu.memory_space<vmem>>, vector<16x128xbf16>
    %7 = arith.extf %6 : vector<16x128xbf16> to vector<16x128xf32>
    %8 = arith.mulf %5, %7 : vector<16x128xf32>
    %cst_7 = arith.constant dense<0.000000e+00> : vector<16xf32>
    %9 = vector.multi_reduction <add>, %8, %cst_7 [1] : vector<16x128xf32> to vector<16xf32>
    %10 = vector.shape_cast %9 : vector<16xf32> to vector<16x1xf32>
    %11 = arith.truncf %5 : vector<16x128xf32> to vector<16x128xbf16>
    %c0_8 = arith.constant 0 : index
    %c0_9 = arith.constant 0 : index
    %12 = vector.load %arg4[%c0_8, %c0_9] : memref<128x128xbf16, #tpu.memory_space<vmem>>, vector<128x128xbf16>
    %cst_10 = arith.constant dense<0.000000e+00> : vector<16x128xf32>
    %13 = tpu.matmul %11, %12, %cst_10 {dimension_numbers = #tpu.dot_dimension_numbers<[1], [0], [0], [1], [0, 0, 1, 1], [], []>} : vector<16x128xbf16>, vector<128x128xbf16>, vector<16x128xf32> -> vector<16x128xf32>
    %c0_11 = arith.constant 0 : index
    %c0_12 = arith.constant 0 : index
    %14 = vector.load %arg6[%c0_11, %c0_12] : memref<16x128xbf16, #tpu.memory_space<vmem>>, vector<16x128xbf16>
    %15 = arith.extf %14 : vector<16x128xbf16> to vector<16x128xf32>
    %16 = arith.addf %13, %15 : vector<16x128xf32>
    %cst_13 = arith.constant dense<0xFF800000> : vector<16xf32>
    %17 = vector.multi_reduction <maximumf>, %16, %cst_13 [1] : vector<16x128xf32> to vector<16xf32>
    %18 = vector.shape_cast %17 : vector<16xf32> to vector<16x1xf32>
    %19 = arith.maximumf %18, %10 : vector<16x1xf32>
    %20 = vector.broadcast %19 : vector<16x1xf32> to vector<16x128xf32>
    %21 = arith.subf %16, %20 : vector<16x128xf32>
    %22 = math.exp %21 : vector<16x128xf32>
    %cst_14 = arith.constant dense<0.000000e+00> : vector<16xf32>
    %23 = vector.multi_reduction <add>, %22, %cst_14 [1] : vector<16x128xf32> to vector<16xf32>
    %24 = vector.shape_cast %23 : vector<16xf32> to vector<16x1xf32>
    %25 = arith.subf %10, %19 : vector<16x1xf32>
    %26 = math.exp %25 : vector<16x1xf32>
    %27 = arith.addf %24, %26 : vector<16x1xf32>
    %28 = arith.subf %10, %19 : vector<16x1xf32>
    %29 = math.log %27 : vector<16x1xf32>
    %30 = arith.subf %28, %29 : vector<16x1xf32>
    %c16_i32 = arith.constant 16 : i32
    %31 = arith.muli %arg0, %c16_i32 : i32
    %32 = tpu.iota {dimensions = array<i32: 0>} : vector<16x1xi32>
    %33 = vector.broadcast %31 : i32 to vector<16x1xi32>
    %34 = arith.addi %33, %32 : vector<16x1xi32>
    %c4_i32 = arith.constant 4 : i32
    %35 = vector.broadcast %c4_i32 : i32 to vector<16x1xi32>
    %36 = arith.cmpi slt, %34, %35 : vector<16x1xi32>
    %cst_15 = arith.constant 0.000000e+00 : f32
    %37 = vector.broadcast %cst_15 : f32 to vector<16x1xf32>
    %38 = arith.select %36, %30, %37 : vector<16x1xi1>, vector<16x1xf32>
    %39 = vector.shape_cast %38 : vector<16x1xf32> to vector<1x16x1xf32>
    %cst_16 = arith.constant dense<0.000000e+00> : vector<1xf32>
    %40 = vector.multi_reduction <add>, %39, %cst_16 [1, 2] : vector<1x16x1xf32> to vector<1xf32>
    %41 = vector.shape_cast %40 : vector<1xf32> to vector<1x1x1xf32>
    %42 = vector.extract %41[0, 0, 0] : f32 from vector<1x1x1xf32>
    %43 = vector.broadcast %42 : f32 to vector<1x8x128xf32>
    %c0_17 = arith.constant 0 : index
    %c0_18 = arith.constant 0 : index
    %c0_19 = arith.constant 0 : index
    %44 = vector.load %arg7[%c0_17, %c0_18, %c0_19] : memref<1x8x128xf32, #tpu.memory_space<vmem>>, vector<1x8x128xf32>
    tpu.vector_store %arg7[%c0_17, %c0_18, %c0_19], %43 {strides = array<i32>} : memref<1x8x128xf32, #tpu.memory_space<vmem>>, vector<1x8x128xf32>,
    return
  }
  func.func @transform_0(%arg0: i32) -> (i32, i32) {
    %c0_i32 = arith.constant 0 : i32
    %c0_i32_0 = arith.constant 0 : i32
    return %arg0, %c0_i32 : i32, i32
  }
  func.func @transform_1(%arg0: i32) -> (i32, i32) {
    %c0_i32 = arith.constant 0 : i32
    %c0_i32_0 = arith.constant 0 : i32
    %c0_i32_1 = arith.constant 0 : i32
    return %c0_i32, %c0_i32_0 : i32, i32
  }
  func.func @transform_2(%arg0: i32) -> (i32, i32) {
    %c0_i32 = arith.constant 0 : i32
    %c0_i32_0 = arith.constant 0 : i32
    %c0_i32_1 = arith.constant 0 : i32
    return %c0_i32, %c0_i32_0 : i32, i32
  }
  func.func @transform_3(%arg0: i32) -> (i32, i32) {
    %c0_i32 = arith.constant 0 : i32
    %c0_i32_0 = arith.constant 0 : i32
    %c0_i32_1 = arith.constant 0 : i32
    return %c0_i32, %c0_i32_0 : i32, i32
  }
  func.func @transform_4(%arg0: i32) -> (i32, i32) {
    %c0_i32 = arith.constant 0 : i32
    %c0_i32_0 = arith.constant 0 : i32
    return %arg0, %c0_i32 : i32, i32
  }
  func.func @transform_5(%arg0: i32) -> (i32, i32) {
    %c0_i32 = arith.constant 0 : i32
    %c0_i32_0 = arith.constant 0 : i32
    return %arg0, %c0_i32 : i32, i32
  }
  func.func @transform_6(%arg0: i32) -> (i32, i32, i32) {
    %c0_i32 = arith.constant 0 : i32
    %c0_i32_0 = arith.constant 0 : i32
    %c0_i32_1 = arith.constant 0 : i32
    return %arg0, %c0_i32, %c0_i32_0 : i32, i32, i32
  }
}

</mosaic_0001>

<bundles_post_ra>
// kernel: tpu_custom_call.1
= control target key start
LH: loop header
LB: loop body
LE: loop exit
PB: predicated region body
PF: predicated region fallthrough
CT: control target
= control target key end

     0   :  { %11 = vsyncpa [#allocation3], 0  ;;  %s696_s0 = inlined_call_operand.hbm [shape: bf16[16,128], index: 0, kind: input, shape index: {}]   ;;  %s697_s1 = inlined_call_operand.hbm [shape: bf16[128,128], index: 1, kind: input, shape index: {}]   ;;  %s698_s2 = inlined_call_operand.vmem [shape: f32[1,128], index: 2, kind: input, shape index: {}]   ;;  %s699_s3 = inlined_call_operand.hbm [shape: bf16[128,128], index: 3, kind: input, shape index: {}]   ;;  %s700_s4 = inlined_call_operand.hbm [shape: bf16[16,128], index: 4, kind: input, shape index: {}]   ;;  %s701_s5 = inlined_call_operand.vmem [shape: bf16[16,128], index: 5, kind: input, shape index: {}]   ;;  %s702_s6 = inlined_call_operand.hbm [shape: f32[1,8,128], index: 6, kind: output, shape index: {}]  }
   0x1   :  { %12 = vsyncpa [#allocation6], 0 }
   0x2   :  { %13 = vsyncpa [#allocation9], 0 }
   0x3   :  { %14 = vsyncpa [#allocation4], 0  ;;  %s619_s21 = smov [#allocation5]   ;;  %s620_s23 = smov [#allocation2]  }
   0x4   :  { %s32_s22 = sshll.u32 %s619_s21, 4  ;;  %s20_s24 = sshll.u32 %s620_s23, 4  ;;  %s33_s22 = int_to_ptr.vmem [resolvable:$true] %s32_s22  ;;  %s21_s24 = int_to_ptr.vmem [resolvable:$true] %s20_s24 }
   0x5   :  { %s519_s25 = scalar_lea.vmem %s33_s22, 1024  ;;  %p524_p1 = scmp.lt.s32.totalorder %s33_s22, %s33_s22 }
   0x6   :  { %p520_p0 = scmp.ne.s32.totalorder %s33_s22, %s519_s25  ;;  %p525_p2 = scmp.lt.s32.totalorder %s519_s25, %s519_s25 }
   0x8   :  { %p526_p3 = por %p525_p2, %p524_p1 }
   0xa   :  { %p527_p4 = pnand %p526_p3, %p520_p0 }
   0xc   :  { %530 = shalt.err (!%p527_p4)
}
   0xd   :  { %s621_s26 = smov 64   ;;  %s622_s27 = smov 4  }
   0xe   :  { %38 = dma.hbm_to_vmem [thread:$0]  %s697_s1, 1024, %s33_s22, [#allocation6], %s621_s26, %s621_s26, %s622_s27  }
   0xf   :  { %s539_s30 = scalar_lea.vmem %s21_s24, 128  ;;  %p544_p6 = scmp.lt.s32.totalorder %s21_s24, %s21_s24 }
  0x10   :  { %p540_p5 = scmp.ne.s32.totalorder %s21_s24, %s539_s30  ;;  %p545_p7 = scmp.lt.s32.totalorder %s539_s30, %s539_s30 }
  0x12   :  { %p546_p8 = por %p545_p7, %p544_p6 }
  0x14   :  { %p547_p9 = pnand %p546_p8, %p540_p5 }
  0x16   :  { %550 = shalt.err (!%p547_p9)
}
  0x17   :  { %26 = dma.hbm_to_vmem [thread:$0]  %s696_s0, 128, %s21_s24, [#allocation3], %s621_s26, %s621_s26, %s622_s27  }
  0x18   :  { %s623_s9 = smov [#allocation7]   ;;  %s624_s11 = smov [#allocation8]  }
  0x19   :  { %s46_s10 = sshll.u32 %s623_s9, 4  ;;  %s58_s12 = sshll.u32 %s624_s11, 4  ;;  %s47_s10 = int_to_ptr.vmem [resolvable:$true] %s46_s10  ;;  %s59_s12 = int_to_ptr.vmem [resolvable:$true] %s58_s12 }
  0x1a   :  { %s559_s1 = scalar_lea.vmem %s47_s10, 1024  ;;  %p564_p11 = scmp.lt.s32.totalorder %s47_s10, %s47_s10 }
  0x1b   :  { %p560_p10 = scmp.ne.s32.totalorder %s47_s10, %s559_s1  ;;  %p565_p12 = scmp.lt.s32.totalorder %s559_s1, %s559_s1 }
  0x1d   :  { %p566_p13 = por %p565_p12, %p564_p11 }
  0x1f   :  { %p567_p0 = pnand %p566_p13, %p560_p10 }
  0x21   :  { %570 = shalt.err (!%p567_p0)
}
  0x22   :  { %52 = dma.hbm_to_vmem [thread:$0]  %s699_s3, 1024, %s47_s10, [#allocation6], %s621_s26, %s621_s26, %s622_s27  }
  0x23   :  { %s579_s0 = scalar_lea.vmem %s59_s12, 128  ;;  %p584_p2 = scmp.lt.s32.totalorder %s59_s12, %s59_s12 }
  0x24   :  { %p580_p1 = scmp.ne.s32.totalorder %s59_s12, %s579_s0  ;;  %p585_p3 = scmp.lt.s32.totalorder %s579_s0, %s579_s0 }
  0x26   :  { %p586_p4 = por %p585_p3, %p584_p2 }
  0x28   :  { %p587_p5 = pnand %p586_p4, %p580_p1 }
  0x2a   :  { %590 = shalt.err (!%p587_p5)
}
  0x2b   :  { %64 = dma.hbm_to_vmem [thread:$0]  %s700_s4, 128, %s59_s12, [#allocation9], %s621_s26, %s621_s26, %s622_s27  }
  0x2c   :  { %611 = dma.done.wait [#allocation3], 128  }
  0x2d   :  { %612 = vsyncadd [#allocation3], 4294967168 }
  0x2e   :  { %613 = dma.done.wait [#allocation6], 2048  }
  0x2f   :  { %614 = vsyncadd [#allocation6], 4294965248 }
  0x30   :  { %615 = dma.done.wait [#allocation9], 128  }
  0x31   :  { %616 = vsyncadd [#allocation9], 4294967168  ;;  %v625_v0 = vmov 0.0   ;;  %vm626_vm0 = vmmov 0   ;;  %v488_v1 = vld [vmem:[#allocation5 + $0x38] sm:$0xff]   ;;  %v489_v2 = vld [vmem:[#allocation5 + $0x30] sm:$0xff]   ;;  %v351_v47 = vlaneseq }
  0x32   :  { %437 = vmatprep.subr.bf16.mxu0 %v625_v0  ;;  %453 = vmatprep.mubr.msk.bf16.mxu0 %vm626_vm0, %v625_v0  ;;  %v490_v3 = vld [vmem:[#allocation5 + $0x28] sm:$0xff]   ;;  %v497_v4 = vld [vmem:[#allocation7 + $0x38] sm:$0xff]   ;;  %v491_v5 = vld [vmem:[#allocation5 + $0x20] sm:$0xff]   ;;  %vm361_vm2 = vcmask 7168  }
  0x33   :  { %457 = vmatprep.subr.bf16.mxu1 %v625_v0  ;;  %473 = vmatprep.mubr.msk.bf16.mxu1 %vm626_vm0, %v625_v0  ;;  %v498_v6 = vld [vmem:[#allocation7 + $0x30] sm:$0xff]   ;;  %v492_v7 = vld [vmem:[#allocation5 + $0x18] sm:$0xff]   ;;  %v499_v8 = vld [vmem:[#allocation7 + $0x28] sm:$0xff]   ;;  %v352_v48 = vshrl.u32 %v351_v47, 7 }
  0x34   :  { %438 = vmatpush3.bf16.msra.mxu0 %v488_v1  ;;  %458 = vmatpush3.bf16.msra.mxu1 %v497_v4  ;;  %v493_v9 = vld [vmem:[#allocation5 + $0x10] sm:$0xff]   ;;  %v500_v10 = vld [vmem:[#allocation7 + $0x20] sm:$0xff]   ;;  %v494_v11 = vld [vmem:[#allocation5 + $0x8] sm:$0xff]  }
  0x35   :  { %439 = vmatprep.subr.bf16.mxu0 %v625_v0  ;;  %459 = vmatprep.subr.bf16.mxu1 %v625_v0  ;;  %v501_v12 = vld [vmem:[#allocation7 + $0x18] sm:$0xff]   ;;  %v495_v13 = vld [vmem:[#allocation5] sm:$0xff]   ;;  %v502_v14 = vld [vmem:[#allocation7 + $0x10] sm:$0xff]   ;;  %vm357_vm1 = vcmp.lt.s32.totalorder %v352_v48, 4 }
  0x36   :  { %v496_v15 = vld [vmem:[#allocation2] sm:$0xff]   ;;  %v503_v16 = vld [vmem:[#allocation7 + $0x8] sm:$0xff]   ;;  %v504_v17 = vld [vmem:[#allocation7] sm:$0xff]  }
  0x37   :  { %v412_v18 = vld [vmem:[#allocation8] sm:$0xf]   ;;  %v393_v19 = vld [vmem:[%s698_s2] ss:$0 sm:$0xff]  ;;  %s627_s2 = smov [#allocation10]  }
  0x38   :  { %440 = vmatpush3.bf16.msra.mxu0 %v489_v2  ;;  %460 = vmatpush3.bf16.msra.mxu1 %v498_v6  ;;  %v413_v20 = vunpack.c.l.bf16 %v412_v18  ;;  %v416_v29 = vld [vmem:[%s701_s5] sm:$0xf]   ;;  %s382_s5 = sshll.u32 %s627_s2, 4  ;;  %s383_s5 = int_to_ptr.vmem [resolvable:$true] %s382_s5 }
  0x39   :  { %441 = vmatprep.subr.bf16.mxu0 %v625_v0  ;;  %461 = vmatprep.subr.bf16.mxu1 %v625_v0  ;;  %v417_v30 = vunpack.c.l.bf16 %v416_v29  ;;  %s591_s20 = scalar_lea.vmem %s383_s5, 128  ;;  %p596_p7 = scmp.lt.s32.totalorder %s383_s5, %s383_s5 }
  0x3a   :  { %p592_p6 = scmp.ne.s32.totalorder %s383_s5, %s591_s20  ;;  %p597_p8 = scmp.lt.s32.totalorder %s591_s20, %s591_s20 }
  0x3c   :  { %442 = vmatpush3.bf16.msra.mxu0 %v490_v3  ;;  %462 = vmatpush3.bf16.msra.mxu1 %v499_v8  ;;  %p598_p9 = por %p597_p8, %p596_p7 }
  0x3d   :  { %443 = vmatprep.subr.bf16.mxu0 %v625_v0  ;;  %463 = vmatprep.subr.bf16.mxu1 %v625_v0 }
  0x3e   :  { %p599_p10 = pnand %p598_p9, %p592_p6 }
  0x40   :  { %444 = vmatpush3.bf16.msra.mxu0 %v491_v5  ;;  %464 = vmatpush3.bf16.msra.mxu1 %v500_v10 }
  0x41   :  { %445 = vmatprep.subr.bf16.mxu0 %v625_v0  ;;  %465 = vmatprep.subr.bf16.mxu1 %v625_v0 }
  0x44   :  { %446 = vmatpush3.bf16.msra.mxu0 %v492_v7  ;;  %466 = vmatpush3.bf16.msra.mxu1 %v501_v12 }
  0x45   :  { %447 = vmatprep.subr.bf16.mxu0 %v625_v0  ;;  %467 = vmatprep.subr.bf16.mxu1 %v625_v0 }
  0x48   :  { %448 = vmatpush3.bf16.msra.mxu0 %v493_v9  ;;  %468 = vmatpush3.bf16.msra.mxu1 %v502_v14 }
  0x49   :  { %449 = vmatprep.subr.bf16.mxu0 %v625_v0  ;;  %469 = vmatprep.subr.bf16.mxu1 %v625_v0 }
  0x4c   :  { %450 = vmatpush3.bf16.msra.mxu0 %v494_v11  ;;  %470 = vmatpush3.bf16.msra.mxu1 %v503_v16 }
  0x4d   :  { %451 = vmatprep.subr.bf16.mxu0 %v625_v0  ;;  %471 = vmatprep.subr.bf16.mxu1 %v625_v0 }
  0x50   :  { %452 = vmatpush3.bf16.msra.mxu0 %v495_v13  ;;  %472 = vmatpush3.bf16.msra.mxu1 %v504_v17 }
  0x53   :  { %454 = vmatmul.mubr.bf16.vlgmr.msra.gmra.mxu0 %v496_v15 }
 0x113   :  { %v193_v21 = vpop.f32.mrf.mxu0 }
 0x114   :  { %v194_v22 = vadd.f32 %v393_v19, %v193_v21 }
 0x115   :  { %v455_v23 = vpop.f32.mrf.mxu0 }
 0x116   :  { %v204_v24 = vmul.f32 %v413_v20, %v194_v22 }
 0x117   :  { %v196_v25 = vpop.f32.mrf.mxu0 }
 0x118   :  { %v197_v26 = vadd.f32 %v393_v19, %v196_v25  ;;  %206 = vadd.xlane.f32.xlu0 %v204_v24 }
 0x119   :  { %v456_v27 = vpop.f32.mrf.mxu0 }
 0x11a   :  { %v210_v28 = vpack.c.bf16 %v197_v26, %v194_v22 }
 0x11c   :  { %474 = vmatmul.mubr.bf16.vlgmr.msra.gmra.mxu1 %v210_v28 }
 0x1a1   :  { %v207_v36 = vpop.xlane.xlu0 %206 }
 0x1dc   :  { %v313_v31 = vpop.f32.mrf.mxu1 }
 0x1dd   :  { %v314_v32 = vadd.f32 %v417_v30, %v313_v31 }
 0x1de   :  { %v475_v33 = vpop.f32.mrf.mxu1 }
 0x1df   :  { %320 = vmax.xlane.f32.xlu0 %v314_v32 }
 0x1e0   :  { %v316_v34 = vpop.f32.mrf.mxu1 }
 0x1e2   :  { %v476_v35 = vpop.f32.mrf.mxu1 }
 0x268   :  { %v321_v37 = vpop.xlane.xlu0 %320 }
 0x269   :  { %v324_v38 = vmax.f32 %v321_v37, %v207_v36 }
 0x26b   :  { %v326_v39 = vsub.f32 %v314_v32, %v324_v38  ;;  %v336_v40 = vsub.f32 %v207_v36, %v324_v38 }
 0x26d   :  { %v328_v41 = vmul.f32 1.442695, %v326_v39  ;;  %v338_v43 = vmul.f32 1.442695, %v336_v40 }
 0x26f   :  { %505 = vpow2.f32 %v328_v41 }
 0x270   :  { %507 = vpow2.f32 %v338_v43 }
 0x27c   :  { %v506_v42 = vpop.eup %505 }
 0x27d   :  { %332 = vadd.xlane.f32.xlu1 %v506_v42  ;;  %v508_v44 = vpop.eup %507 }
 0x306   :  { %v333_v45 = vpop.xlane.xlu1 %332 }
 0x307   :  { %v342_v46 = vadd.f32 %v508_v44, %v333_v45 }
 0x309   :  { %509 = vlog2.f32 %v342_v46 }
 0x316   :  { %v510_v49 = vpop.eup %509 }
 0x317   :  { %v345_v50 = vmul.f32 0.6931472, %v510_v49 }
 0x319   :  { %v348_v51 = vsub.f32 %v336_v40, %v345_v50 }
 0x31b   :  { %v359_v52 = vsel %vm357_vm1, %v348_v51, 0.0 }
 0x31c   :  { %v362_v53 = vsel %vm361_vm2, %v359_v52, 0.0 }
 0x31d   :  { %365 = vadd.xlane.f32.xlu1 %v362_v53 }
 0x3a6   :  { %v366_v54 = vpop.xlane.xlu1 %365 }
 0x3a7   :  { %v367_v55 = vrot.slane %v366_v54, 4 }
 0x3a9   :  { %v368_v56 = vadd.f32 %v367_v55, %v366_v54 }
 0x3ab   :  { %v369_v57 = vrot.slane %v368_v56, 2 }
 0x3ad   :  { %v370_v58 = vadd.f32 %v369_v57, %v368_v56 }
 0x3af   :  { %v371_v59 = vrot.slane %v370_v58, 1 }
 0x3b1   :  { %v372_v60 = vadd.f32 %v371_v59, %v370_v58 }
 0x3b3   :  { %477 = vpush %v372_v60 }
 0x3e4   :  { %s478_s19 = spop %477 }
 0x3e5   :  { %v374_v61 = vstv %s478_s19 }
 0x3e6   :  { %375 = vst [vmem:[#allocation10] sm:$0xff] %v374_v61 }
 0x3e7   :  { %602 = shalt.err (!%p599_p10)
}
 0x3e8   :  { %385 = dma.vmem_to_hbm [thread:$0]  %s383_s5, 128, %s702_s6, [#allocation4]  }
 0x3e9   :  { %617 = dma.done.wait [#allocation4], 128  }
 0x3ea   :  { %618 = vsyncadd [#allocation4], 4294967168 }
 0x3eb   :  { %389 = vsyncpa [#allocation3], 1 }
 0x3ec   :  { %390 = vsyncpa [#allocation6], 1 }
 0x3ed   :  { %391 = vsyncpa [#allocation9], 1 }
 0x3ee   :  { %392 = vsyncpa [#allocation4], 1 }

</bundles_post_ra>
